<compile_context>
chip_gen: v7x
topology: tpu7x:2x2x1
jax: 0.10.0
libtpu: 0.0.40
codegen_flags: <defaults>
</compile_context>

<pallas_src>
import jax
import jax.numpy as jnp
from jax.experimental import pallas as pl
from jax.experimental.pallas import tpu as pltpu


def _round_up(v, m):
    return (v + m - 1) // m * m


def _pad2(a, rows, cols):
    return jnp.pad(a, ((0, rows - a.shape[0]), (0, cols - a.shape[1])))


def _leaky_relu(x, negative_slope=0.01):
    return jnp.where(x > 0, x, negative_slope * x)


def _generator_fnn_kernel(
    x_ref, cond_ref,
    w1_ref, b1_ref,
    w2_ref, b2_ref,
    w3_ref, b3_ref,
    w4_ref, b4_ref,
    w5_ref, b5_ref,
    out_ref,
):
    # TODO(synk): training-mode Dropout (stochastic masking) is omitted
    # (eval-mode identity); it would need pltpu.prng_* inside the kernel.
    f32 = jnp.float32
    cdt = w2_ref.dtype  # MXU operand dtype (bf16 by default, f32 for checking)

    # ---- layer 1 as ONE K=(Lp+Cp)-deep MXU pass ---------------------------
    # cat([x, emb(cond)]) @ W1 == [x_pad | one_hot(cond)] @ [[W1x_pad      ],
    #                                                        [embedding@W1e]]
    # (embedding @ W1[L:] is pre-folded in the wrapper, so gather + embedding
    #  matmul + concat collapse into this single full-depth matmul).
    idx = cond_ref[...]                                       # (TM, 1) int32
    tm = idx.shape[0]
    cp = w1_ref.shape[0] - x_ref.shape[1]                     # Cp
    iota = jax.lax.broadcasted_iota(jnp.int32, (tm, cp), 1)
    one_hot = (iota == idx).astype(cdt)                       # (TM, Cp)
    lhs = jnp.concatenate([x_ref[...], one_hot], axis=1)      # (TM, Lp+Cp)
    h = jnp.dot(lhs, w1_ref[...], preferred_element_type=f32)
    h = _leaky_relu(h + b1_ref[...])                          # (TM, D1p) f32

    def dense(h, w_ref, b_ref, act=True):
        # bf16 (or f32) operands into the MXU, f32 accumulation & epilogue.
        y = jnp.dot(h.astype(cdt), w_ref[...], preferred_element_type=f32)
        y = y + b_ref[...]                       # (1, Np) f32, broadcasts
        return _leaky_relu(y) if act else y

    h = dense(h, w2_ref, b2_ref)                 # (TM, D2p)
    h = dense(h, w3_ref, b3_ref)                 # (TM, D3p)
    h = dense(h, w4_ref, b4_ref)                 # (TM, D4p)
    h = dense(h, w5_ref, b5_ref, act=False)      # (TM, Dop)  (no tanh)
    # TODO(synk): optional further writeback trim (pack 4 logical 32-lane rows
    # into one 128-lane row via the idle XLU) not implemented; secondary since
    # the kernel is MXU-cadence bound.
    out_ref[...] = h.astype(out_ref.dtype)


def generator_fnn_forward(x, condition, params, *, compute_dtype=jnp.bfloat16,
                          block_tm=None):
    """x: [B, latent] f32, condition: [B] int -> [B, features*sequence_len] f32."""
    B, L = x.shape
    C, E = params["embedding"].shape
    Dout = params["w5"].shape[1]

    # Lane-pad every matmul dim to a multiple of 128 (zero padding; zeros
    # propagate exactly through LeakyReLU / subsequent zero weight rows).
    Lp = _round_up(L, 128)
    Cp = _round_up(C, 128)
    D1p = _round_up(params["w1"].shape[1], 128)
    D2p = _round_up(params["w2"].shape[1], 128)
    D3p = _round_up(params["w3"].shape[1], 128)
    D4p = _round_up(params["w4"].shape[1], 128)
    Dop = _round_up(Dout, 128)

    cdt, f32 = compute_dtype, jnp.float32

    # One-time parameter packing (XLA glue; do at load time in a real model).
    w1 = params["w1"]
    w1x = _pad2(w1[:L], Lp, D1p)                               # rows acting on x
    # Fold the embedding through layer 1:  emb @ W1e == one_hot @ (E @ W1e).
    emb_w1 = _pad2(params["embedding"] @ w1[L:], Cp, D1p)      # f32 fold
    w1s = jnp.concatenate([w1x, emb_w1], axis=0).astype(cdt)   # (Lp+Cp, D1p)
    w2p = _pad2(params["w2"], D1p, D2p).astype(cdt)
    w3p = _pad2(params["w3"], D2p, D3p).astype(cdt)
    w4p = _pad2(params["w4"], D3p, D4p).astype(cdt)
    w5p = _pad2(params["w5"], D4p, Dop).astype(cdt)
    b1p = _pad2(params["b1"], 1, D1p).astype(f32)
    b2p = _pad2(params["b2"], 1, D2p).astype(f32)
    b3p = _pad2(params["b3"], 1, D3p).astype(f32)
    b4p = _pad2(params["b4"], 1, D4p).astype(f32)
    b5p = _pad2(params["b5"], 1, Dop).astype(f32)

    # Batch tile: big, evenly dividing B (per-step fixed cost + weight re-push
    # dominates small tiles for this tiny net). Force >=2 tiles when B >= 256
    # so the "parallel" batch axis can shard across v7x's 2 TensorCores.
    if block_tm is None:
        cap = 1024
        n_tiles = max(-(-B // cap), 2 if B >= 256 else 1)
        block_tm = _round_up(-(-B // n_tiles), 16)
    TM = block_tm
    assert TM % 8 == 0
    Bp = _round_up(B, TM)

    # x lane-padded to a 128-multiple (layer-1 LHS half) and pre-cast to the
    # compute dtype in the wrapper (halves per-row input DMA for bf16).
    x_p = _pad2(x, Bp, Lp).astype(cdt)
    # Padded batch rows reuse condition 0; results are sliced away below.
    cond_p = jnp.pad(condition.astype(jnp.int32), (0, Bp - B)).reshape(Bp, 1)

    def tiled(shape):            # tiled over batch
        return pl.BlockSpec(shape, lambda i: (i, 0))

    def resident(shape):         # constant block index -> DMA'd once, stays in VMEM
        return pl.BlockSpec(shape, lambda i: (0, 0))

    in_specs = [
        tiled((TM, Lp)),                # x (lane-padded, compute dtype)
        tiled((TM, 1)),                 # condition indices
        resident((Lp + Cp, D1p)), resident((1, D1p)),   # stacked W1 / b1
        resident((D1p, D2p)), resident((1, D2p)),
        resident((D2p, D3p)), resident((1, D3p)),
        resident((D3p, D4p)), resident((1, D4p)),
        resident((D4p, Dop)), resident((1, Dop)),
    ]
    out_spec = tiled((TM, Dop))

    weights = (w1s, b1p, w2p, b2p, w3p, b3p, w4p, b4p, w5p, b5p)
    out_itemsize = jnp.dtype(cdt).itemsize
    flops = 2 * Bp * ((Lp + Cp) * D1p + D1p * D2p + D2p * D3p
                      + D3p * D4p + D4p * Dop)
    bytes_accessed = (int(x_p.size) * x_p.dtype.itemsize + int(cond_p.size) * 4
                      + Bp * Dop * out_itemsize
                      + sum(int(a.size) * a.dtype.itemsize for a in weights))

    out_p = pl.pallas_call(
        _generator_fnn_kernel,
        # Store the padded output in the compute dtype (bf16 by default):
        # cuts the dominant HBM writeback ~2x; wrapper slices + upcasts.
        out_shape=jax.ShapeDtypeStruct((Bp, Dop), cdt),
        grid_spec=pltpu.PrefetchScalarGridSpec(
            num_scalar_prefetch=0,
            grid=(Bp // TM,),
            in_specs=in_specs,
            out_specs=out_spec,
        ),
        compiler_params=pltpu.CompilerParams(
            # batch axis is independent -> shard across TCs on v7x megacore
            dimension_semantics=("parallel",),
            # Explicit headroom so large TM still pipelines on v5e's 16 MiB
            # default scoped limit; well under v7x's 64 MiB physical VMEM.
            vmem_limit_bytes=48 * 1024 * 1024,
        ),
        cost_estimate=pl.CostEstimate(
            flops=int(flops), transcendentals=0,
            bytes_accessed=int(bytes_accessed)),
    )(x_p, cond_p, *weights)

    # Logical slice (drop batch + lane padding) + upcast — cheap XLA glue.
    return out_p[:B, :Dout].astype(jnp.float32)


def init_params(key, latent, features, sequence_len, conditions, embeddings):
    """Deterministic synthetic parameter init (matches module's layer shapes)."""
    dims = [
        (latent + embeddings, 2 * latent),
        (2 * latent, 4 * latent),
        (4 * latent, 8 * latent),
        (8 * latent, 4 * latent),
        (4 * latent, features * sequence_len),
    ]
    params = {}
    key, ek = jax.random.split(key)
    params["embedding"] = (
        0.1 * jax.random.normal(ek, (conditions, embeddings), jnp.float32)
    )
    for i, (din, dout) in enumerate(dims, start=1):
        key, wk, bk = jax.random.split(key, 3)
        params[f"w{i}"] = (
            jax.random.normal(wk, (din, dout), jnp.float32) / jnp.sqrt(din)
        )
        params[f"b{i}"] = 0.01 * jax.random.normal(bk, (1, dout), jnp.float32)
    return params


def _reference_forward(x, condition, params):
    """Pure-JAX f32 reference for correctness check."""
    emb = jnp.take(params["embedding"], condition, axis=0)
    h = jnp.concatenate([x, emb], axis=1)
    for i in range(1, 5):
        h = _leaky_relu(h @ params[f"w{i}"] + params[f"b{i}"])
    return h @ params["w5"] + params["b5"]


if __name__ == "__main__":
    latent_vector_size = 16
    features = 4
    sequence_len = 8
    conditions = 10
    embeddings = 16
    batch = 8

    key = jax.random.PRNGKey(0)
    key, xk, ck, pk = jax.random.split(key, 4)

    x = jax.random.normal(xk, (batch, latent_vector_size), jnp.float32)
    condition = jax.random.randint(ck, (batch,), 0, conditions, jnp.int32)
    params = init_params(
        pk, latent_vector_size, features, sequence_len, conditions, embeddings
    )
    ref = _reference_forward(x, condition, params)

    # 1) f32 compute path: tight structural check (folded layer-1, padding, tiling).
    out_f32 = jax.block_until_ready(
        generator_fnn_forward(x, condition, params, compute_dtype=jnp.float32))
    assert out_f32.shape == (batch, features * sequence_len)
    assert jnp.allclose(out_f32, ref, atol=1e-4, rtol=1e-4)

    # 2) default bf16-operand path (v6e/v7x MXU peak), f32 accumulation/epilogue.
    out_bf16 = jax.block_until_ready(
        generator_fnn_forward(x, condition, params, compute_dtype=jnp.bfloat16))
    assert jnp.allclose(out_bf16, ref, atol=5e-2, rtol=5e-2)

    # 3) multi-step grid path: batch not a multiple of the tile (200 -> tiles of 64).
    batch2 = 200
    key, xk2, ck2 = jax.random.split(key, 3)
    x2 = jax.random.normal(xk2, (batch2, latent_vector_size), jnp.float32)
    cond2 = jax.random.randint(ck2, (batch2,), 0, conditions, jnp.int32)
    out2 = jax.block_until_ready(
        generator_fnn_forward(x2, cond2, params,
                              compute_dtype=jnp.float32, block_tm=64))
    ref2 = _reference_forward(x2, cond2, params)
    assert out2.shape == (batch2, features * sequence_len)
    assert jnp.allclose(out2, ref2, atol=1e-4, rtol=1e-4)

    print("KERNEL_OK")
</pallas_src>

<mosaic_0001>
module attributes {stable_mosaic.version = 11 : i64} {
  func.func @_generator_fnn_kernel(%arg0: i32, %arg1: memref<16x128xf32, #tpu.memory_space<vmem>>, %arg2: memref<16x1xi32, #tpu.memory_space<vmem>>, %arg3: memref<256x128xf32, #tpu.memory_space<vmem>>, %arg4: memref<1x128xf32, #tpu.memory_space<vmem>>, %arg5: memref<128x128xf32, #tpu.memory_space<vmem>>, %arg6: memref<1x128xf32, #tpu.memory_space<vmem>>, %arg7: memref<128x128xf32, #tpu.memory_space<vmem>>, %arg8: memref<1x128xf32, #tpu.memory_space<vmem>>, %arg9: memref<128x128xf32, #tpu.memory_space<vmem>>, %arg10: memref<1x128xf32, #tpu.memory_space<vmem>>, %arg11: memref<128x128xf32, #tpu.memory_space<vmem>>, %arg12: memref<1x128xf32, #tpu.memory_space<vmem>>, %arg13: memref<16x128xf32, #tpu.memory_space<vmem>>) attributes {dimension_semantics = [#tpu.dimension_semantics<parallel>], iteration_bounds = array<i64: 1>, scalar_prefetch = 0 : i64, scratch_operands = 0 : i64, tpu.core_type = #tpu.core_type<tc>, window_params = [{transform_indices = @transform_0, window_bounds = array<i64: 16, 128>}, {transform_indices = @transform_1, window_bounds = array<i64: 16, 1>}, {pipeline_mode = #tpu.pipeline_mode<synchronous>, transform_indices = @transform_2, window_bounds = array<i64: 256, 128>}, {pipeline_mode = #tpu.pipeline_mode<synchronous>, transform_indices = @transform_3, window_bounds = array<i64: 1, 128>}, {pipeline_mode = #tpu.pipeline_mode<synchronous>, transform_indices = @transform_4, window_bounds = array<i64: 128, 128>}, {pipeline_mode = #tpu.pipeline_mode<synchronous>, transform_indices = @transform_5, window_bounds = array<i64: 1, 128>}, {pipeline_mode = #tpu.pipeline_mode<synchronous>, transform_indices = @transform_6, window_bounds = array<i64: 128, 128>}, {pipeline_mode = #tpu.pipeline_mode<synchronous>, transform_indices = @transform_7, window_bounds = array<i64: 1, 128>}, {pipeline_mode = #tpu.pipeline_mode<synchronous>, transform_indices = @transform_8, window_bounds = array<i64: 128, 128>}, {pipeline_mode = #tpu.pipeline_mode<synchronous>, transform_indices = @transform_9, window_bounds = array<i64: 1, 128>}, {pipeline_mode = #tpu.pipeline_mode<synchronous>, transform_indices = @transform_10, window_bounds = array<i64: 128, 128>}, {pipeline_mode = #tpu.pipeline_mode<synchronous>, transform_indices = @transform_11, window_bounds = array<i64: 1, 128>}, {transform_indices = @transform_12, window_bounds = array<i64: 16, 128>}]} {
    %c0 = arith.constant 0 : index
    %c0_0 = arith.constant 0 : index
    %0 = vector.load %arg2[%c0, %c0_0] : memref<16x1xi32, #tpu.memory_space<vmem>>, vector<16x1xi32>
    %1 = tpu.iota {dimensions = array<i32: 1>} : vector<16x128xi32>
    %2 = vector.broadcast %0 : vector<16x1xi32> to vector<16x128xi32>
    %3 = arith.cmpi eq, %1, %2 : vector<16x128xi32>
    %4 = arith.extui %3 : vector<16x128xi1> to vector<16x128xi32>
    %5 = arith.sitofp %4 : vector<16x128xi32> to vector<16x128xf32>
    %c0_1 = arith.constant 0 : index
    %c0_2 = arith.constant 0 : index
    %6 = vector.load %arg1[%c0_1, %c0_2] : memref<16x128xf32, #tpu.memory_space<vmem>>, vector<16x128xf32>
    %7 = tpu.concatenate %6, %5 in 1 : vector<16x128xf32>, vector<16x128xf32> -> vector<16x256xf32>
    %c0_3 = arith.constant 0 : index
    %c0_4 = arith.constant 0 : index
    %8 = vector.load %arg3[%c0_3, %c0_4] : memref<256x128xf32, #tpu.memory_space<vmem>>, vector<256x128xf32>
    %cst = arith.constant dense<0.000000e+00> : vector<16x128xf32>
    %9 = tpu.matmul %7, %8, %cst {dimension_numbers = #tpu.dot_dimension_numbers<[1], [0], [0], [1], [0, 0, 1, 1], [], []>} : vector<16x256xf32>, vector<256x128xf32>, vector<16x128xf32> -> vector<16x128xf32>
    %c0_5 = arith.constant 0 : index
    %c0_6 = arith.constant 0 : index
    %10 = vector.load %arg4[%c0_5, %c0_6] : memref<1x128xf32, #tpu.memory_space<vmem>>, vector<1x128xf32>
    %11 = vector.broadcast %10 : vector<1x128xf32> to vector<16x128xf32>
    %12 = arith.addf %9, %11 : vector<16x128xf32>
    %cst_7 = arith.constant 0.000000e+00 : f32
    %13 = vector.broadcast %cst_7 : f32 to vector<16x128xf32>
    %14 = arith.cmpf ogt, %12, %13 : vector<16x128xf32>
    %cst_8 = arith.constant 0.00999999977 : f32
    %15 = vector.broadcast %cst_8 : f32 to vector<16x128xf32>
    %16 = arith.mulf %15, %12 : vector<16x128xf32>
    %17 = arith.select %14, %12, %16 : vector<16x128xi1>, vector<16x128xf32>
    %c0_9 = arith.constant 0 : index
    %c0_10 = arith.constant 0 : index
    %18 = vector.load %arg5[%c0_9, %c0_10] : memref<128x128xf32, #tpu.memory_space<vmem>>, vector<128x128xf32>
    %cst_11 = arith.constant dense<0.000000e+00> : vector<16x128xf32>
    %19 = tpu.matmul %17, %18, %cst_11 {dimension_numbers = #tpu.dot_dimension_numbers<[1], [0], [0], [1], [0, 0, 1, 1], [], []>} : vector<16x128xf32>, vector<128x128xf32>, vector<16x128xf32> -> vector<16x128xf32>
    %c0_12 = arith.constant 0 : index
    %c0_13 = arith.constant 0 : index
    %20 = vector.load %arg6[%c0_12, %c0_13] : memref<1x128xf32, #tpu.memory_space<vmem>>, vector<1x128xf32>
    %21 = vector.broadcast %20 : vector<1x128xf32> to vector<16x128xf32>
    %22 = arith.addf %19, %21 : vector<16x128xf32>
    %cst_14 = arith.constant 0.000000e+00 : f32
    %23 = vector.broadcast %cst_14 : f32 to vector<16x128xf32>
    %24 = arith.cmpf ogt, %22, %23 : vector<16x128xf32>
    %cst_15 = arith.constant 0.00999999977 : f32
    %25 = vector.broadcast %cst_15 : f32 to vector<16x128xf32>
    %26 = arith.mulf %25, %22 : vector<16x128xf32>
    %27 = arith.select %24, %22, %26 : vector<16x128xi1>, vector<16x128xf32>
    %c0_16 = arith.constant 0 : index
    %c0_17 = arith.constant 0 : index
    %28 = vector.load %arg7[%c0_16, %c0_17] : memref<128x128xf32, #tpu.memory_space<vmem>>, vector<128x128xf32>
    %cst_18 = arith.constant dense<0.000000e+00> : vector<16x128xf32>
    %29 = tpu.matmul %27, %28, %cst_18 {dimension_numbers = #tpu.dot_dimension_numbers<[1], [0], [0], [1], [0, 0, 1, 1], [], []>} : vector<16x128xf32>, vector<128x128xf32>, vector<16x128xf32> -> vector<16x128xf32>
    %c0_19 = arith.constant 0 : index
    %c0_20 = arith.constant 0 : index
    %30 = vector.load %arg8[%c0_19, %c0_20] : memref<1x128xf32, #tpu.memory_space<vmem>>, vector<1x128xf32>
    %31 = vector.broadcast %30 : vector<1x128xf32> to vector<16x128xf32>
    %32 = arith.addf %29, %31 : vector<16x128xf32>
    %cst_21 = arith.constant 0.000000e+00 : f32
    %33 = vector.broadcast %cst_21 : f32 to vector<16x128xf32>
    %34 = arith.cmpf ogt, %32, %33 : vector<16x128xf32>
    %cst_22 = arith.constant 0.00999999977 : f32
    %35 = vector.broadcast %cst_22 : f32 to vector<16x128xf32>
    %36 = arith.mulf %35, %32 : vector<16x128xf32>
    %37 = arith.select %34, %32, %36 : vector<16x128xi1>, vector<16x128xf32>
    %c0_23 = arith.constant 0 : index
    %c0_24 = arith.constant 0 : index
    %38 = vector.load %arg9[%c0_23, %c0_24] : memref<128x128xf32, #tpu.memory_space<vmem>>, vector<128x128xf32>
    %cst_25 = arith.constant dense<0.000000e+00> : vector<16x128xf32>
    %39 = tpu.matmul %37, %38, %cst_25 {dimension_numbers = #tpu.dot_dimension_numbers<[1], [0], [0], [1], [0, 0, 1, 1], [], []>} : vector<16x128xf32>, vector<128x128xf32>, vector<16x128xf32> -> vector<16x128xf32>
    %c0_26 = arith.constant 0 : index
    %c0_27 = arith.constant 0 : index
    %40 = vector.load %arg10[%c0_26, %c0_27] : memref<1x128xf32, #tpu.memory_space<vmem>>, vector<1x128xf32>
    %41 = vector.broadcast %40 : vector<1x128xf32> to vector<16x128xf32>
    %42 = arith.addf %39, %41 : vector<16x128xf32>
    %cst_28 = arith.constant 0.000000e+00 : f32
    %43 = vector.broadcast %cst_28 : f32 to vector<16x128xf32>
    %44 = arith.cmpf ogt, %42, %43 : vector<16x128xf32>
    %cst_29 = arith.constant 0.00999999977 : f32
    %45 = vector.broadcast %cst_29 : f32 to vector<16x128xf32>
    %46 = arith.mulf %45, %42 : vector<16x128xf32>
    %47 = arith.select %44, %42, %46 : vector<16x128xi1>, vector<16x128xf32>
    %c0_30 = arith.constant 0 : index
    %c0_31 = arith.constant 0 : index
    %48 = vector.load %arg11[%c0_30, %c0_31] : memref<128x128xf32, #tpu.memory_space<vmem>>, vector<128x128xf32>
    %cst_32 = arith.constant dense<0.000000e+00> : vector<16x128xf32>
    %49 = tpu.matmul %47, %48, %cst_32 {dimension_numbers = #tpu.dot_dimension_numbers<[1], [0], [0], [1], [0, 0, 1, 1], [], []>} : vector<16x128xf32>, vector<128x128xf32>, vector<16x128xf32> -> vector<16x128xf32>
    %c0_33 = arith.constant 0 : index
    %c0_34 = arith.constant 0 : index
    %50 = vector.load %arg12[%c0_33, %c0_34] : memref<1x128xf32, #tpu.memory_space<vmem>>, vector<1x128xf32>
    %51 = vector.broadcast %50 : vector<1x128xf32> to vector<16x128xf32>
    %52 = arith.addf %49, %51 : vector<16x128xf32>
    %c0_35 = arith.constant 0 : index
    %c0_36 = arith.constant 0 : index
    %53 = vector.load %arg13[%c0_35, %c0_36] : memref<16x128xf32, #tpu.memory_space<vmem>>, vector<16x128xf32>
    tpu.vector_store %arg13[%c0_35, %c0_36], %52 {strides = array<i32>} : memref<16x128xf32, #tpu.memory_space<vmem>>, vector<16x128xf32>,
    return
  }
  func.func @transform_0(%arg0: i32) -> (i32, i32) {
    %c0_i32 = arith.constant 0 : i32
    %c0_i32_0 = arith.constant 0 : i32
    return %arg0, %c0_i32 : i32, i32
  }
  func.func @transform_1(%arg0: i32) -> (i32, i32) {
    %c0_i32 = arith.constant 0 : i32
    %c0_i32_0 = arith.constant 0 : i32
    return %arg0, %c0_i32 : i32, i32
  }
  func.func @transform_2(%arg0: i32) -> (i32, i32) {
    %c0_i32 = arith.constant 0 : i32
    %c0_i32_0 = arith.constant 0 : i32
    %c0_i32_1 = arith.constant 0 : i32
    return %c0_i32, %c0_i32_0 : i32, i32
  }
  func.func @transform_3(%arg0: i32) -> (i32, i32) {
    %c0_i32 = arith.constant 0 : i32
    %c0_i32_0 = arith.constant 0 : i32
    %c0_i32_1 = arith.constant 0 : i32
    return %c0_i32, %c0_i32_0 : i32, i32
  }
  func.func @transform_4(%arg0: i32) -> (i32, i32) {
    %c0_i32 = arith.constant 0 : i32
    %c0_i32_0 = arith.constant 0 : i32
    %c0_i32_1 = arith.constant 0 : i32
    return %c0_i32, %c0_i32_0 : i32, i32
  }
  func.func @transform_5(%arg0: i32) -> (i32, i32) {
    %c0_i32 = arith.constant 0 : i32
    %c0_i32_0 = arith.constant 0 : i32
    %c0_i32_1 = arith.constant 0 : i32
    return %c0_i32, %c0_i32_0 : i32, i32
  }
  func.func @transform_6(%arg0: i32) -> (i32, i32) {
    %c0_i32 = arith.constant 0 : i32
    %c0_i32_0 = arith.constant 0 : i32
    %c0_i32_1 = arith.constant 0 : i32
    return %c0_i32, %c0_i32_0 : i32, i32
  }
  func.func @transform_7(%arg0: i32) -> (i32, i32) {
    %c0_i32 = arith.constant 0 : i32
    %c0_i32_0 = arith.constant 0 : i32
    %c0_i32_1 = arith.constant 0 : i32
    return %c0_i32, %c0_i32_0 : i32, i32
  }
  func.func @transform_8(%arg0: i32) -> (i32, i32) {
    %c0_i32 = arith.constant 0 : i32
    %c0_i32_0 = arith.constant 0 : i32
    %c0_i32_1 = arith.constant 0 : i32
    return %c0_i32, %c0_i32_0 : i32, i32
  }
  func.func @transform_9(%arg0: i32) -> (i32, i32) {
    %c0_i32 = arith.constant 0 : i32
    %c0_i32_0 = arith.constant 0 : i32
    %c0_i32_1 = arith.constant 0 : i32
    return %c0_i32, %c0_i32_0 : i32, i32
  }
  func.func @transform_10(%arg0: i32) -> (i32, i32) {
    %c0_i32 = arith.constant 0 : i32
    %c0_i32_0 = arith.constant 0 : i32
    %c0_i32_1 = arith.constant 0 : i32
    return %c0_i32, %c0_i32_0 : i32, i32
  }
  func.func @transform_11(%arg0: i32) -> (i32, i32) {
    %c0_i32 = arith.constant 0 : i32
    %c0_i32_0 = arith.constant 0 : i32
    %c0_i32_1 = arith.constant 0 : i32
    return %c0_i32, %c0_i32_0 : i32, i32
  }
  func.func @transform_12(%arg0: i32) -> (i32, i32) {
    %c0_i32 = arith.constant 0 : i32
    %c0_i32_0 = arith.constant 0 : i32
    return %arg0, %c0_i32 : i32, i32
  }
}

</mosaic_0001>

<bundles_post_ra>
// kernel: tpu_custom_call.1
= control target key start
LH: loop header
LB: loop body
LE: loop exit
PB: predicated region body
PF: predicated region fallthrough
CT: control target
= control target key end

     0   :  { %17 = vsyncpa [#allocation3], 0  ;;  %s1455_s0 = inlined_call_operand.vmem [shape: f32[16,128], index: 0, kind: input, shape index: {}]   ;;  %s1456_s1 = inlined_call_operand.vmem [shape: s32[16,1], index: 1, kind: input, shape index: {}]   ;;  %s1457_s2 = inlined_call_operand.hbm [shape: f32[256,128], index: 2, kind: input, shape index: {}]   ;;  %s1458_s3 = inlined_call_operand.vmem [shape: f32[1,128], index: 3, kind: input, shape index: {}]   ;;  %s1459_s4 = inlined_call_operand.hbm [shape: f32[128,128], index: 4, kind: input, shape index: {}]   ;;  %s1460_s5 = inlined_call_operand.vmem [shape: f32[1,128], index: 5, kind: input, shape index: {}]   ;;  %s1461_s6 = inlined_call_operand.hbm [shape: f32[128,128], index: 6, kind: input, shape index: {}]   ;;  %s1462_s7 = inlined_call_operand.vmem [shape: f32[1,128], index: 7, kind: input, shape index: {}]   ;;  %s1463_s8 = inlined_call_operand.hbm [shape: f32[128,128], index: 8, kind: input, shape index: {}]   ;;  %s1464_s9 = inlined_call_operand.vmem [shape: f32[1,128], index: 9, kind: input, shape index: {}]   ;;  %s1465_s10 = inlined_call_operand.hbm [shape: f32[128,128], index: 10, kind: input, shape index: {}]   ;;  %s1466_s11 = inlined_call_operand.vmem [shape: f32[1,128], index: 11, kind: input, shape index: {}]   ;;  %s1467_s12 = inlined_call_operand.hbm [shape: f32[16,128], index: 12, kind: output, shape index: {}]  }
   0x1   :  { %18 = vsyncpa [#allocation6], 0 }
   0x2   :  { %19 = vsyncpa [#allocation9], 0 }
   0x3   :  { %20 = vsyncpa [#allocation4], 0  ;;  %s1249_s21 = smov [#allocation5]   ;;  %s1250_s23 = smov [#allocation8]  }
   0x4   :  { %s44_s22 = sshll.u32 %s1249_s21, 4  ;;  %s72_s24 = sshll.u32 %s1250_s23, 4  ;;  %s45_s22 = int_to_ptr.vmem [resolvable:$true] %s44_s22  ;;  %s1324_s24 = int_to_ptr.vmem [resolvable:$true] %s72_s24 }
   0x5   :  { %s1109_s27 = scalar_lea.hbm %s1459_s4, 2048 }
   0x6   :  { %p1110_p0 = scmp.ne.s32.totalorder %s1459_s4, %s1109_s27  ;;  %p1113_p1 = scmp.lt.u32.totalorder %s1109_s27, %s1459_s4 }
   0x8   :  { %p1115_p2 = pnand %p1113_p1, %p1110_p0 }
   0xa   :  { %1118 = shalt.err (!%p1115_p2)
}
   0xb   :  { %s1119_s14 = scalar_lea.vmem %s45_s22, 2048  ;;  %p1124_p4 = scmp.lt.s32.totalorder %s45_s22, %s45_s22 }
   0xc   :  { %p1120_p3 = scmp.ne.s32.totalorder %s45_s22, %s1119_s14  ;;  %p1125_p5 = scmp.lt.s32.totalorder %s1119_s14, %s1119_s14 }
   0xe   :  { %p1126_p6 = por %p1125_p5, %p1124_p4 }
  0x10   :  { %p1127_p7 = pnand %p1126_p6, %p1120_p3 }
  0x12   :  { %1130 = shalt.err (!%p1127_p7)
}
  0x13   :  { %s1251_s15 = smov 128   ;;  %s1252_s16 = smov 8  }
  0x14   :  { %50 = dma.hbm_to_vmem [thread:$0]  %s1459_s4, 2048, %s45_s22, [#allocation6], %s1251_s15, %s1251_s15, %s1252_s16  }
  0x15   :  { %s1131_s21 = scalar_lea.hbm %s1463_s8, 2048 }
  0x16   :  { %p1132_p8 = scmp.ne.s32.totalorder %s1463_s8, %s1131_s21  ;;  %p1135_p9 = scmp.lt.u32.totalorder %s1131_s21, %s1463_s8 }
  0x18   :  { %p1137_p10 = pnand %p1135_p9, %p1132_p8 }
  0x1a   :  { %1140 = shalt.err (!%p1137_p10)
}
  0x1b   :  { %s1141_s28 = scalar_lea.vmem %s1324_s24, 2048  ;;  %p1146_p12 = scmp.lt.s32.totalorder %s1324_s24, %s1324_s24 }
  0x1c   :  { %p1142_p11 = scmp.ne.s32.totalorder %s1324_s24, %s1141_s28  ;;  %p1147_p13 = scmp.lt.s32.totalorder %s1141_s28, %s1141_s28 }
  0x1e   :  { %p1148_p0 = por %p1147_p13, %p1146_p12 }
  0x20   :  { %p1149_p1 = pnand %p1148_p0, %p1142_p11 }
  0x22   :  { %1152 = shalt.err (!%p1149_p1)
}
  0x23   :  { %78 = dma.hbm_to_vmem [thread:$0]  %s1463_s8, 2048, %s1324_s24, [#allocation9], %s1251_s15, %s1251_s15, %s1252_s16  }
  0x24   :  { %s1253_s29 = smov [#allocation2]   ;;  %s1254_s13 = smov [#allocation7]  }
  0x25   :  { %s30_s30 = sshll.u32 %s1253_s29, 4  ;;  %s58_s14 = sshll.u32 %s1254_s13, 4  ;;  %s31_s30 = int_to_ptr.vmem [resolvable:$true] %s30_s30  ;;  %s1361_s14 = int_to_ptr.vmem [resolvable:$true] %s58_s14 }
  0x26   :  { %s1153_s19 = scalar_lea.hbm %s1457_s2, 4096 }
  0x27   :  { %p1154_p2 = scmp.ne.s32.totalorder %s1457_s2, %s1153_s19  ;;  %p1157_p3 = scmp.lt.u32.totalorder %s1153_s19, %s1457_s2 }
  0x29   :  { %p1159_p4 = pnand %p1157_p3, %p1154_p2 }
  0x2b   :  { %1162 = shalt.err (!%p1159_p4)
}
  0x2c   :  { %s1163_s8 = scalar_lea.vmem %s31_s30, 4096  ;;  %p1168_p6 = scmp.lt.s32.totalorder %s31_s30, %s31_s30 }
  0x2d   :  { %p1164_p5 = scmp.ne.s32.totalorder %s31_s30, %s1163_s8  ;;  %p1169_p7 = scmp.lt.s32.totalorder %s1163_s8, %s1163_s8 }
  0x2f   :  { %p1170_p8 = por %p1169_p7, %p1168_p6 }
  0x31   :  { %p1171_p9 = pnand %p1170_p8, %p1164_p5 }
  0x33   :  { %1174 = shalt.err (!%p1171_p9)
}
  0x34   :  { %36 = dma.hbm_to_vmem [thread:$0]  %s1457_s2, 4096, %s31_s30, [#allocation3], %s1251_s15, %s1251_s15, %s1252_s16  }
  0x35   :  { %s1175_s4 = scalar_lea.hbm %s1461_s6, 2048 }
  0x36   :  { %p1176_p10 = scmp.ne.s32.totalorder %s1461_s6, %s1175_s4  ;;  %p1179_p11 = scmp.lt.u32.totalorder %s1175_s4, %s1461_s6 }
  0x38   :  { %p1181_p12 = pnand %p1179_p11, %p1176_p10 }
  0x3a   :  { %1184 = shalt.err (!%p1181_p12)
}
  0x3b   :  { %s1185_s18 = scalar_lea.vmem %s1361_s14, 2048  ;;  %p1190_p0 = scmp.lt.s32.totalorder %s1361_s14, %s1361_s14 }
  0x3c   :  { %p1186_p13 = scmp.ne.s32.totalorder %s1361_s14, %s1185_s18  ;;  %p1191_p1 = scmp.lt.s32.totalorder %s1185_s18, %s1185_s18 }
  0x3e   :  { %p1192_p2 = por %p1191_p1, %p1190_p0 }
  0x40   :  { %p1193_p3 = pnand %p1192_p2, %p1186_p13 }
  0x42   :  { %1196 = shalt.err (!%p1193_p3)
}
  0x43   :  { %64 = dma.hbm_to_vmem [thread:$0]  %s1461_s6, 2048, %s1361_s14, [#allocation6], %s1251_s15, %s1251_s15, %s1252_s16  }
  0x44   :  { %s1255_s19 = smov [#allocation10]   ;;  %s1197_s25 = scalar_lea.hbm %s1465_s10, 2048 }
  0x45   :  { %s86_s20 = sshll.u32 %s1255_s19, 4  ;;  %p1198_p4 = scmp.ne.s32.totalorder %s1465_s10, %s1197_s25  ;;  %s87_s20 = int_to_ptr.vmem [resolvable:$true] %s86_s20 }
  0x46   :  { %p1201_p5 = scmp.lt.u32.totalorder %s1197_s25, %s1465_s10 }
  0x48   :  { %p1203_p6 = pnand %p1201_p5, %p1198_p4 }
  0x4a   :  { %1206 = shalt.err (!%p1203_p6)
}
  0x4b   :  { %s1207_s28 = scalar_lea.vmem %s87_s20, 2048  ;;  %p1212_p8 = scmp.lt.s32.totalorder %s87_s20, %s87_s20 }
  0x4c   :  { %p1208_p7 = scmp.ne.s32.totalorder %s87_s20, %s1207_s28  ;;  %p1213_p9 = scmp.lt.s32.totalorder %s1207_s28, %s1207_s28 }
  0x4e   :  { %p1214_p10 = por %p1213_p9, %p1212_p8 }
  0x50   :  { %p1215_p11 = pnand %p1214_p10, %p1208_p7 }
  0x52   :  { %1218 = shalt.err (!%p1215_p11)
}
  0x53   :  { %92 = dma.hbm_to_vmem [thread:$0]  %s1465_s10, 2048, %s87_s20, [#allocation9], %s1251_s15, %s1251_s15, %s1252_s16  }
  0x54   :  { %1241 = dma.done.wait [#allocation3], 4096  }
  0x55   :  { %1242 = vsyncadd [#allocation3], 4294963200 }
  0x56   :  { %1243 = dma.done.wait [#allocation6], 4096  }
  0x57   :  { %1244 = vsyncadd [#allocation6], 4294963200 }
  0x58   :  { %1245 = dma.done.wait [#allocation9], 4096  }
  0x59   :  { %1246 = vsyncadd [#allocation9], 4294963200  ;;  %v1256_v0 = vmov 0   ;;  %v110_v1 = vld [vmem:[%s1456_s1] sm:$0xff]  ;;  %v111_v2 = vld [vmem:[%s1456_s1 + $0x8] sm:$0xff]  ;;  %s1258_s25 = smov [#allocation11]  }
  0x5a   :  { %1108 = vset.pattern.permute.xlu0 %v1256_v0  ;;  %v144_v3 = vld [vmem:[#allocation2 + $0x80] sm:$0xff]  ;;  %v145_v4 = vld [vmem:[#allocation2 + $0x88] sm:$0xff]  ;;  %v146_v9 = vld [vmem:[#allocation2 + $0x90] sm:$0xff]  ;;  %s665_s8 = sshll.u32 %s1258_s25, 4  ;;  %s666_s8 = int_to_ptr.vmem [resolvable:$true] %s665_s8 }
  0x5b   :  { %115 = vperm.xlu0 %1108, %v110_v1   ;;  %v128_v5 = vld [vmem:[#allocation2] sm:$0xff]  ;;  %v129_v6 = vld [vmem:[#allocation2 + $0x8] sm:$0xff]  ;;  %v938_v7 = vpack.c.bf16 %v145_v4, %v144_v3  ;;  %v147_v10 = vld [vmem:[#allocation2 + $0x98] sm:$0xff]  ;;  %p1224_p13 = scmp.lt.s32.totalorder %s666_s8, %s666_s8 }
  0x5c   :  { %v940_v8 = vpack.c.bf16 %v129_v6, %v128_v5  ;;  %v130_v11 = vld [vmem:[#allocation2 + $0x10] sm:$0xff]  ;;  %v942_v12 = vpack.c.bf16 %v147_v10, %v146_v9  ;;  %v131_v13 = vld [vmem:[#allocation2 + $0x18] sm:$0xff]  ;;  %v148_v14 = vld [vmem:[#allocation2 + $0xa0] sm:$0xff]  ;;  %v1257_v6 = vmov 1.0  }
  0x5d   :  { %v149_v15 = vld [vmem:[#allocation2 + $0xa8] sm:$0xff]  ;;  %939 = vmatprep.subr.bf16.mxu0 %v938_v7  ;;  %v944_v16 = vpack.c.bf16 %v131_v13, %v130_v11  ;;  %v132_v18 = vld [vmem:[#allocation2 + $0x20] sm:$0xff]  ;;  %v150_v20 = vld [vmem:[#allocation2 + $0xb0] sm:$0xff] }
  0x5e   :  { %941 = vmatpush3.bf16.msra.mxu0 %v940_v8  ;;  %v946_v17 = vpack.c.bf16 %v149_v15, %v148_v14  ;;  %v133_v19 = vld [vmem:[#allocation2 + $0x28] sm:$0xff]  ;;  %v151_v21 = vld [vmem:[#allocation2 + $0xb8] sm:$0xff]  ;;  %v134_v24 = vld [vmem:[#allocation2 + $0x30] sm:$0xff] }
  0x5f   :  { %118 = vperm.xlu0 %1108, %v111_v2   ;;  %943 = vmatprep.subr.bf16.mxu0 %v942_v12  ;;  %v948_v22 = vpack.c.bf16 %v133_v19, %v132_v18  ;;  %v950_v23 = vpack.c.bf16 %v151_v21, %v150_v20  ;;  %v135_v25 = vld [vmem:[#allocation2 + $0x38] sm:$0xff]  ;;  %v152_v26 = vld [vmem:[#allocation2 + $0xc0] sm:$0xff]  ;;  %v153_v27 = vld [vmem:[#allocation2 + $0xc8] sm:$0xff]  ;;  %v112_v2 = vlaneseq }
  0x60   :  { %v248_v28 = vld [vmem:[#allocation5] sm:$0xff]  ;;  %v249_v29 = vld [vmem:[#allocation5 + $0x8] sm:$0xff]  ;;  %v250_v30 = vld [vmem:[#allocation5 + $0x10] sm:$0xff]  ;;  %v952_v31 = vpack.c.bf16 %v135_v25, %v134_v24  ;;  %v954_v35 = vpack.c.bf16 %v153_v27, %v152_v26 }
  0x61   :  { %v136_v32 = vld [vmem:[#allocation2 + $0x40] sm:$0xff]  ;;  %v970_v33 = vpack.c.bf16 %v249_v29, %v248_v28  ;;  %v251_v34 = vld [vmem:[#allocation5 + $0x18] sm:$0xff]  ;;  %v137_v36 = vld [vmem:[#allocation2 + $0x48] sm:$0xff]  ;;  %v113_v3 = vand.u32 127, %v112_v2 }
  0x62   :  { %945 = vmatpush3.bf16.msra.mxu0 %v944_v16  ;;  %v974_v37 = vpack.c.bf16 %v251_v34, %v250_v30  ;;  %v252_v38 = vld [vmem:[#allocation5 + $0x20] sm:$0xff]  ;;  %v253_v39 = vld [vmem:[#allocation5 + $0x28] sm:$0xff]  ;;  %v154_v40 = vld [vmem:[#allocation2 + $0xd0] sm:$0xff]  ;;  %v956_v42 = vpack.c.bf16 %v137_v36, %v136_v32 }
  0x63   :  { %947 = vmatprep.subr.bf16.mxu0 %v946_v17  ;;  %v155_v41 = vld [vmem:[#allocation2 + $0xd8] sm:$0xff]  ;;  %971 = vmatprep.subr.bf16.mxu1 %v970_v33  ;;  %v138_v43 = vld [vmem:[#allocation2 + $0x50] sm:$0xff]  ;;  %v978_v44 = vpack.c.bf16 %v253_v39, %v252_v38  ;;  %v156_v49 = vld [vmem:[#allocation2 + $0xe0] sm:$0xff] }
  0x64   :  { %973 = vmatpush3.bf16.msra.mxu1 %v970_v33  ;;  %v958_v45 = vpack.c.bf16 %v155_v41, %v154_v40  ;;  %v139_v46 = vld [vmem:[#allocation2 + $0x58] sm:$0xff]  ;;  %v254_v47 = vld [vmem:[#allocation5 + $0x30] sm:$0xff]  ;;  %v157_v50 = vld [vmem:[#allocation2 + $0xe8] sm:$0xff] }
  0x65   :  { %975 = vmatprep.subr.bf16.mxu1 %v974_v37  ;;  %v255_v48 = vld [vmem:[#allocation5 + $0x38] sm:$0xff]  ;;  %v960_v51 = vpack.c.bf16 %v139_v46, %v138_v43  ;;  %v140_v52 = vld [vmem:[#allocation2 + $0x60] sm:$0xff]  ;;  %v962_v54 = vpack.c.bf16 %v157_v50, %v156_v49  ;;  %v141_v55 = vld [vmem:[#allocation2 + $0x68] sm:$0xff] }
  0x66   :  { %949 = vmatpush3.bf16.msra.mxu0 %v948_v22  ;;  %v982_v53 = vpack.c.bf16 %v255_v48, %v254_v47  ;;  %v256_v56 = vld [vmem:[#allocation5 + $0x40] sm:$0xff]  ;;  %v257_v57 = vld [vmem:[#allocation5 + $0x48] sm:$0xff]  ;;  %v158_v58 = vld [vmem:[#allocation2 + $0xf0] sm:$0xff]  ;;  %v964_v60 = vpack.c.bf16 %v141_v55, %v140_v52 }
  0x67   :  { %951 = vmatprep.subr.bf16.mxu0 %v950_v23  ;;  %v159_v59 = vld [vmem:[#allocation2 + $0xf8] sm:$0xff]  ;;  %v986_v61 = vpack.c.bf16 %v257_v57, %v256_v56  ;;  %v142_v63 = vld [vmem:[#allocation2 + $0x70] sm:$0xff]  ;;  %v126_v5 = vld [vmem:[%s1455_s0] sm:$0xff] }
  0x68   :  { %977 = vmatpush3.bf16.msra.mxu1 %v974_v37  ;;  %v966_v62 = vpack.c.bf16 %v159_v59, %v158_v58  ;;  %v143_v0 = vld [vmem:[#allocation2 + $0x78] sm:$0xff]  ;;  %v127_v8 = vld [vmem:[%s1455_s0 + $0x8] sm:$0xff]  ;;  %v258_v9 = vld [vmem:[#allocation5 + $0x50] sm:$0xff] }
  0x69   :  { %979 = vmatprep.subr.bf16.mxu1 %v978_v44  ;;  %v968_v1 = vpack.c.bf16 %v143_v0, %v142_v63  ;;  %v259_v10 = vld [vmem:[#allocation5 + $0x58] sm:$0xff]  ;;  %v260_v12 = vld [vmem:[#allocation5 + $0x60] sm:$0xff]  ;;  %v261_v13 = vld [vmem:[#allocation5 + $0x68] sm:$0xff] }
  0x6a   :  { %953 = vmatpush3.bf16.msra.mxu0 %v952_v31  ;;  %v990_v11 = vpack.c.bf16 %v259_v10, %v258_v9  ;;  %v994_v14 = vpack.c.bf16 %v261_v13, %v260_v12  ;;  %v262_v15 = vld [vmem:[#allocation5 + $0x70] sm:$0xff]  ;;  %v263_v16 = vld [vmem:[#allocation5 + $0x78] sm:$0xff]  ;;  %v352_v18 = vld [vmem:[#allocation7] sm:$0xff] }
  0x6b   :  { %955 = vmatprep.subr.bf16.mxu0 %v954_v35  ;;  %v998_v17 = vpack.c.bf16 %v263_v16, %v262_v15  ;;  %v353_v19 = vld [vmem:[#allocation7 + $0x8] sm:$0xff]  ;;  %v354_v20 = vld [vmem:[#allocation7 + $0x10] sm:$0xff]  ;;  %v355_v22 = vld [vmem:[#allocation7 + $0x18] sm:$0xff] }
  0x6c   :  { %981 = vmatpush3.bf16.msra.mxu1 %v978_v44  ;;  %v1002_v21 = vpack.c.bf16 %v353_v19, %v352_v18  ;;  %v1006_v23 = vpack.c.bf16 %v355_v22, %v354_v20  ;;  %v356_v24 = vld [vmem:[#allocation7 + $0x20] sm:$0xff]  ;;  %v357_v25 = vld [vmem:[#allocation7 + $0x28] sm:$0xff]  ;;  %v358_v27 = vld [vmem:[#allocation7 + $0x30] sm:$0xff] }
  0x6d   :  { %983 = vmatprep.subr.bf16.mxu1 %v982_v53  ;;  %v1010_v26 = vpack.c.bf16 %v357_v25, %v356_v24  ;;  %v359_v28 = vld [vmem:[#allocation7 + $0x38] sm:$0xff]  ;;  %v360_v30 = vld [vmem:[#allocation7 + $0x40] sm:$0xff]  ;;  %v361_v31 = vld [vmem:[#allocation7 + $0x48] sm:$0xff] }
  0x6e   :  { %957 = vmatpush3.bf16.msra.mxu0 %v956_v42  ;;  %v1014_v29 = vpack.c.bf16 %v359_v28, %v358_v27  ;;  %v1018_v32 = vpack.c.bf16 %v361_v31, %v360_v30  ;;  %v362_v33 = vld [vmem:[#allocation7 + $0x50] sm:$0xff]  ;;  %v363_v34 = vld [vmem:[#allocation7 + $0x58] sm:$0xff]  ;;  %v681_v37 = vld [vmem:[%s1458_s3] ss:$0 sm:$0xff] }
  0x6f   :  { %959 = vmatprep.subr.bf16.mxu0 %v958_v45  ;;  %v1022_v35 = vpack.c.bf16 %v363_v34, %v362_v33  ;;  %v364_v49 = vld [vmem:[#allocation7 + $0x60] sm:$0xff]  ;;  %v365_v50 = vld [vmem:[#allocation7 + $0x68] sm:$0xff]  ;;  %v366_v52 = vld [vmem:[#allocation7 + $0x70] sm:$0xff] }
  0x70   :  { %985 = vmatpush3.bf16.msra.mxu1 %v982_v53  ;;  %v367_v53 = vld [vmem:[#allocation7 + $0x78] sm:$0xff]  ;;  %v456_v55 = vld [vmem:[#allocation8] sm:$0xff]  ;;  %v457_v56 = vld [vmem:[#allocation8 + $0x8] sm:$0xff] }
  0x71   :  { %987 = vmatprep.subr.bf16.mxu1 %v986_v61  ;;  %v458_v57 = vld [vmem:[#allocation8 + $0x10] sm:$0xff]  ;;  %v1034_v58 = vpack.c.bf16 %v457_v56, %v456_v55  ;;  %v459_v59 = vld [vmem:[#allocation8 + $0x18] sm:$0xff]  ;;  %v684_v9 = vld [vmem:[%s1460_s5] ss:$0 sm:$0xff] }
  0x72   :  { %961 = vmatpush3.bf16.msra.mxu0 %v960_v51  ;;  %v1026_v51 = vpack.c.bf16 %v365_v50, %v364_v49  ;;  %v462_v0 = vld [vmem:[#allocation8 + $0x30] sm:$0xff]  ;;  %v468_v18 = vld [vmem:[#allocation8 + $0x60] sm:$0xff]  ;;  %v469_v19 = vld [vmem:[#allocation8 + $0x68] sm:$0xff] }
  0x73   :  { %963 = vmatprep.subr.bf16.mxu0 %v962_v54  ;;  %v1030_v54 = vpack.c.bf16 %v367_v53, %v366_v52  ;;  %v1058_v20 = vpack.c.bf16 %v469_v19, %v468_v18  ;;  %v471_v22 = vld [vmem:[#allocation8 + $0x78] sm:$0xff]  ;;  %v560_v24 = vld [vmem:[#allocation10] sm:$0xff]  ;;  %v561_v25 = vld [vmem:[#allocation10 + $0x8] sm:$0xff] }
  0x74   :  { %989 = vmatpush3.bf16.msra.mxu1 %v986_v61  ;;  %v460_v61 = vld [vmem:[#allocation8 + $0x20] sm:$0xff]  ;;  %v1066_v27 = vpack.c.bf16 %v561_v25, %v560_v24  ;;  %v563_v28 = vld [vmem:[#allocation10 + $0x18] sm:$0xff]  ;;  %v565_v31 = vld [vmem:[#allocation10 + $0x28] sm:$0xff] }
  0x75   :  { %991 = vmatprep.subr.bf16.mxu1 %v990_v11  ;;  %v564_v30 = vld [vmem:[#allocation10 + $0x20] sm:$0xff]  ;;  %v566_v33 = vld [vmem:[#allocation10 + $0x30] sm:$0xff]  ;;  %v567_v34 = vld [vmem:[#allocation10 + $0x38] sm:$0xff] }
  0x76   :  { %965 = vmatpush3.bf16.msra.mxu0 %v964_v60  ;;  %v1038_v60 = vpack.c.bf16 %v459_v59, %v458_v57  ;;  %v573_v52 = vld [vmem:[#allocation10 + $0x68] sm:$0xff]  ;;  %v575_v55 = vld [vmem:[#allocation10 + $0x78] sm:$0xff]  ;;  %v686_v57 = vld [vmem:[%s1464_s9] ss:$0 sm:$0xff]  ;;  %s1219_s9 = scalar_lea.vmem %s666_s8, 256 }
  0x77   :  { %967 = vmatprep.subr.bf16.mxu0 %v966_v62  ;;  %v461_v62 = vld [vmem:[#allocation8 + $0x28] sm:$0xff]  ;;  %p1220_p12 = scmp.ne.s32.totalorder %s666_s8, %s1219_s9  ;;  %p1225_p0 = scmp.lt.s32.totalorder %s1219_s9, %s1219_s9 }
  0x78   :  { %993 = vmatpush3.bf16.msra.mxu1 %v990_v11  ;;  %v1042_v63 = vpack.c.bf16 %v461_v62, %v460_v61 }
  0x79   :  { %995 = vmatprep.subr.bf16.mxu1 %v994_v14  ;;  %p1226_p1 = por %p1225_p0, %p1224_p13 }
  0x7a   :  { %969 = vmatpush3.bf16.msra.mxu0 %v968_v1  ;;  %v463_v1 = vld [vmem:[#allocation8 + $0x38] sm:$0xff] }
  0x7b   :  { %1003 = vmatprep.subr.bf16.mxu0 %v1002_v21  ;;  %v1046_v2 = vpack.c.bf16 %v463_v1, %v462_v0  ;;  %p1227_p2 = pnand %p1226_p1, %p1220_p12 }
  0x7c   :  { %997 = vmatpush3.bf16.msra.mxu1 %v994_v14 }
  0x7d   :  { %999 = vmatprep.subr.bf16.mxu1 %v998_v17 }
  0x80   :  { %1001 = vmatpush3.bf16.msra.mxu1 %v998_v17 }
  0x81   :  { %1035 = vmatprep.subr.bf16.mxu1 %v1034_v58 }
  0xda   :  { %v116_v4 = vpop.permute.xlu0 %115 }
  0xdb   :  { %vm120_vm0 = vcmp.eq.s32.totalorder %v113_v3, %v116_v4  ;;  %v465_v4 = vld [vmem:[#allocation8 + $0x48] sm:$0xff] }
  0xdc   :  { %682 = vmatprep.mubr.msk.f32.mxu0 %vm120_vm0, %v1257_v6 }
  0xdd   :  { %232 = vmatmul.mubr.f32.vlgmr.msra.gmra.mrb[0].mxu0 %v126_v5 }
  0xde   :  { %v119_v7 = vpop.permute.xlu0 %118  ;;  %1005 = vmatpush3.bf16.msra.mxu0 %v1002_v21  ;;  %v470_v21 = vld [vmem:[#allocation8 + $0x70] sm:$0xff] }
  0xdf   :  { %vm121_vm1 = vcmp.eq.s32.totalorder %v113_v3, %v119_v7  ;;  %1007 = vmatprep.subr.bf16.mxu0 %v1006_v23  ;;  %v464_v3 = vld [vmem:[#allocation8 + $0x40] sm:$0xff]  ;;  %v467_v7 = vld [vmem:[#allocation8 + $0x58] sm:$0xff] }
  0xe0   :  { %683 = vmatprep.mubr.msk.f32.mxu0 %vm121_vm1, %v1257_v6  ;;  %v1050_v5 = vpack.c.bf16 %v465_v4, %v464_v3  ;;  %v466_v6 = vld [vmem:[#allocation8 + $0x50] sm:$0xff] }
  0xe1   :  { %237 = vmatmul.mubr.f32.gmra.mrb[2].mxu0 %v127_v8  ;;  %v1054_v8 = vpack.c.bf16 %v467_v7, %v466_v6 }
  0xe2   :  { %1009 = vmatpush3.bf16.msra.mxu0 %v1006_v23  ;;  %v1062_v23 = vpack.c.bf16 %v471_v22, %v470_v21 }
  0xe3   :  { %1011 = vmatprep.subr.bf16.mxu0 %v1010_v26 }
  0xe6   :  { %1013 = vmatpush3.bf16.msra.mxu0 %v1010_v26  ;;  %v562_v26 = vld [vmem:[#allocation10 + $0x10] sm:$0xff] }
  0xe7   :  { %1015 = vmatprep.subr.bf16.mxu0 %v1014_v29 }
  0xea   :  { %1017 = vmatpush3.bf16.msra.mxu0 %v1014_v29  ;;  %v1070_v29 = vpack.c.bf16 %v563_v28, %v562_v26 }
  0xeb   :  { %1019 = vmatprep.subr.bf16.mxu0 %v1018_v32 }
  0xee   :  { %1021 = vmatpush3.bf16.msra.mxu0 %v1018_v32  ;;  %v1074_v32 = vpack.c.bf16 %v565_v31, %v564_v30 }
  0xef   :  { %1023 = vmatprep.subr.bf16.mxu0 %v1022_v35 }
  0xf2   :  { %1025 = vmatpush3.bf16.msra.mxu0 %v1022_v35  ;;  %v1078_v35 = vpack.c.bf16 %v567_v34, %v566_v33 }
  0xf3   :  { %1027 = vmatprep.subr.bf16.mxu0 %v1026_v51 }
  0xf6   :  { %1029 = vmatpush3.bf16.msra.mxu0 %v1026_v51  ;;  %v572_v51 = vld [vmem:[#allocation10 + $0x60] sm:$0xff] }
  0xf7   :  { %1031 = vmatprep.subr.bf16.mxu0 %v1030_v54  ;;  %v1090_v53 = vpack.c.bf16 %v573_v52, %v572_v51 }
  0xfa   :  { %1033 = vmatpush3.bf16.msra.mxu0 %v1030_v54  ;;  %v574_v54 = vld [vmem:[#allocation10 + $0x70] sm:$0xff] }
  0xfb   :  { %1067 = vmatprep.subr.bf16.mxu0 %v1066_v27  ;;  %v1094_v56 = vpack.c.bf16 %v575_v55, %v574_v54 }
 0x1b0   :  { %v720_v36 = vpop.f32.mrb[0].mxu0 }
 0x1b1   :  { %v721_v38 = vpop.f32.mrb[1].mxu0 }
 0x1b2   :  { %v722_v39 = vadd.f32 %v721_v38, %v720_v36  ;;  %v568_v36 = vld [vmem:[#allocation10 + $0x40] sm:$0xff] }
 0x1b4   :  { %v234_v40 = vadd.f32 %v722_v39, %v681_v37  ;;  %v723_v41 = vpop.f32.mrb[2].mxu0  ;;  %v570_v39 = vld [vmem:[#allocation10 + $0x50] sm:$0xff] }
 0x1b5   :  { %v724_v42 = vpop.f32.mrb[3].mxu0 }
 0x1b6   :  { %v725_v43 = vadd.f32 %v724_v42, %v723_v41  ;;  %vm242_vm2 = vcmp.gt.f32.partialorder %v234_v40, 0.0  ;;  %v244_v44 = vmul.f32 0.01, %v234_v40  ;;  %v685_v42 = vld [vmem:[%s1462_s7] ss:$0 sm:$0xff] }
 0x1b8   :  { %v239_v45 = vadd.f32 %v725_v43, %v681_v37  ;;  %v246_v46 = vsel %vm242_vm2, %v234_v40, %v244_v44  ;;  %v569_v37 = vld [vmem:[#allocation10 + $0x48] sm:$0xff]  ;;  %v571_v40 = vld [vmem:[#allocation10 + $0x58] sm:$0xff] }
 0x1b9   :  { %830 = vmatprep.mubr.f32.mxu1 %v246_v46  ;;  %v1082_v38 = vpack.c.bf16 %v569_v37, %v568_v36  ;;  %v1086_v41 = vpack.c.bf16 %v571_v40, %v570_v39 }
 0x1ba   :  { %vm243_vm3 = vcmp.gt.f32.partialorder %v239_v45, 0.0  ;;  %v245_v47 = vmul.f32 0.01, %v239_v45 }
 0x1bc   :  { %v247_v48 = vsel %vm243_vm3, %v239_v45, %v245_v47 }
 0x1bd   :  { %831 = vmatmul.mubr.f32.vlgmr.msra.gmra.mrb[0].mxu1 %v247_v48 }
 0x1be   :  { %1037 = vmatpush3.bf16.msra.mxu1 %v1034_v58 }
 0x1bf   :  { %1039 = vmatprep.subr.bf16.mxu1 %v1038_v60 }
 0x1c2   :  { %1041 = vmatpush3.bf16.msra.mxu1 %v1038_v60 }
 0x1c3   :  { %1043 = vmatprep.subr.bf16.mxu1 %v1042_v63 }
 0x1c6   :  { %1045 = vmatpush3.bf16.msra.mxu1 %v1042_v63 }
 0x1c7   :  { %1047 = vmatprep.subr.bf16.mxu1 %v1046_v2 }
 0x1ca   :  { %1049 = vmatpush3.bf16.msra.mxu1 %v1046_v2  ;;  %v687_v2 = vld [vmem:[%s1466_s11] ss:$0 sm:$0xff] }
 0x1cb   :  { %1051 = vmatprep.subr.bf16.mxu1 %v1050_v5 }
 0x1ce   :  { %1053 = vmatpush3.bf16.msra.mxu1 %v1050_v5 }
 0x1cf   :  { %1055 = vmatprep.subr.bf16.mxu1 %v1054_v8 }
 0x1d2   :  { %1057 = vmatpush3.bf16.msra.mxu1 %v1054_v8 }
 0x1d3   :  { %1059 = vmatprep.subr.bf16.mxu1 %v1058_v20 }
 0x1d6   :  { %1061 = vmatpush3.bf16.msra.mxu1 %v1058_v20 }
 0x1d7   :  { %1063 = vmatprep.subr.bf16.mxu1 %v1062_v23 }
 0x1da   :  { %1065 = vmatpush3.bf16.msra.mxu1 %v1062_v23 }
 0x290   :  { %v832_v10 = vpop.f32.mrb[0].mxu1 }
 0x291   :  { %v343_v11 = vadd.f32 %v832_v10, %v684_v9  ;;  %v337_v12 = vpop.f32.mrb[1].mxu1 }
 0x292   :  { %v338_v13 = vadd.f32 %v684_v9, %v337_v12 }
 0x293   :  { %v349_v14 = vmul.f32 0.01, %v343_v11  ;;  %vm347_vm4 = vcmp.gt.f32.partialorder %v343_v11, 0.0 }
 0x294   :  { %v348_v15 = vmul.f32 0.01, %v338_v13  ;;  %vm346_vm5 = vcmp.gt.f32.partialorder %v338_v13, 0.0 }
 0x295   :  { %v351_v17 = vsel %vm347_vm4, %v343_v11, %v349_v14 }
 0x296   :  { %v350_v16 = vsel %vm346_vm5, %v338_v13, %v348_v15 }
 0x297   :  { %865 = vmatprep.mubr.f32.mxu0 %v350_v16 }
 0x298   :  { %866 = vmatmul.mubr.f32.vlgmr.msra.gmra.mrb[4].mxu0 %v351_v17 }
 0x299   :  { %1069 = vmatpush3.bf16.msra.mxu0 %v1066_v27 }
 0x29a   :  { %1071 = vmatprep.subr.bf16.mxu0 %v1070_v29 }
 0x29d   :  { %1073 = vmatpush3.bf16.msra.mxu0 %v1070_v29 }
 0x29e   :  { %1075 = vmatprep.subr.bf16.mxu0 %v1074_v32 }
 0x2a1   :  { %1077 = vmatpush3.bf16.msra.mxu0 %v1074_v32 }
 0x2a2   :  { %1079 = vmatprep.subr.bf16.mxu0 %v1078_v35 }
 0x2a5   :  { %1081 = vmatpush3.bf16.msra.mxu0 %v1078_v35 }
 0x2a6   :  { %1083 = vmatprep.subr.bf16.mxu0 %v1082_v38 }
 0x2a9   :  { %1085 = vmatpush3.bf16.msra.mxu0 %v1082_v38 }
 0x2aa   :  { %1087 = vmatprep.subr.bf16.mxu0 %v1086_v41 }
 0x2ad   :  { %1089 = vmatpush3.bf16.msra.mxu0 %v1086_v41 }
 0x2ae   :  { %1091 = vmatprep.subr.bf16.mxu0 %v1090_v53 }
 0x2b1   :  { %1093 = vmatpush3.bf16.msra.mxu0 %v1090_v53 }
 0x2b2   :  { %1095 = vmatprep.subr.bf16.mxu0 %v1094_v56 }
 0x2b5   :  { %1097 = vmatpush3.bf16.msra.mxu0 %v1094_v56 }
 0x36b   :  { %v867_v43 = vpop.f32.mrb[4].mxu0 }
 0x36c   :  { %v447_v44 = vadd.f32 %v867_v43, %v685_v42  ;;  %v441_v45 = vpop.f32.mrb[5].mxu0 }
 0x36d   :  { %v442_v46 = vadd.f32 %v685_v42, %v441_v45 }
 0x36e   :  { %v453_v47 = vmul.f32 0.01, %v447_v44  ;;  %vm451_vm6 = vcmp.gt.f32.partialorder %v447_v44, 0.0 }
 0x36f   :  { %v452_v48 = vmul.f32 0.01, %v442_v46  ;;  %vm450_vm7 = vcmp.gt.f32.partialorder %v442_v46, 0.0 }
 0x370   :  { %v455_v50 = vsel %vm451_vm6, %v447_v44, %v453_v47 }
 0x371   :  { %v454_v49 = vsel %vm450_vm7, %v442_v46, %v452_v48 }
 0x372   :  { %900 = vmatprep.mubr.f32.mxu1 %v454_v49 }
 0x373   :  { %901 = vmatmul.mubr.f32.vlgmr.msra.gmra.mrb[2].mxu1 %v455_v50 }
 0x446   :  { %v902_v58 = vpop.f32.mrb[2].mxu1 }
 0x447   :  { %v551_v59 = vadd.f32 %v902_v58, %v686_v57  ;;  %v545_v60 = vpop.f32.mrb[3].mxu1 }
 0x448   :  { %v546_v61 = vadd.f32 %v686_v57, %v545_v60 }
 0x449   :  { %v557_v62 = vmul.f32 0.01, %v551_v59  ;;  %vm555_vm8 = vcmp.gt.f32.partialorder %v551_v59, 0.0 }
 0x44a   :  { %v556_v63 = vmul.f32 0.01, %v546_v61  ;;  %vm554_vm9 = vcmp.gt.f32.partialorder %v546_v61, 0.0 }
 0x44b   :  { %v559_v1 = vsel %vm555_vm8, %v551_v59, %v557_v62 }
 0x44c   :  { %v558_v0 = vsel %vm554_vm9, %v546_v61, %v556_v63 }
 0x44d   :  { %935 = vmatprep.mubr.f32.mxu0 %v558_v0 }
 0x44e   :  { %936 = vmatmul.mubr.f32.vlgmr.msra.gmra.mrb[6].mxu0 %v559_v1 }
 0x521   :  { %v937_v3 = vpop.f32.mrb[6].mxu0 }
 0x522   :  { %v655_v4 = vadd.f32 %v937_v3, %v687_v2  ;;  %v649_v5 = vpop.f32.mrb[7].mxu0 }
 0x523   :  { %v650_v6 = vadd.f32 %v687_v2, %v649_v5 }
 0x524   :  { %659 = vst [vmem:[#allocation11 + $0x8] sm:$0xff] %v655_v4 }
 0x525   :  { %658 = vst [vmem:[#allocation11] sm:$0xff] %v650_v6 }
 0x526   :  { %1230 = shalt.err (!%p1227_p2)
}
 0x527   :  { %s1231_s11 = scalar_lea.hbm %s1467_s12, 256 }
 0x528   :  { %p1232_p3 = scmp.ne.s32.totalorder %s1467_s12, %s1231_s11  ;;  %p1235_p4 = scmp.lt.u32.totalorder %s1231_s11, %s1467_s12 }
 0x52a   :  { %p1237_p5 = pnand %p1235_p4, %p1232_p3 }
 0x52c   :  { %1240 = shalt.err (!%p1237_p5)
}
 0x52d   :  { %671 = dma.vmem_to_hbm [thread:$0]  %s666_s8, 256, %s1467_s12, [#allocation4], %s1251_s15, %s1251_s15, %s1252_s16  }
 0x52e   :  { %1247 = dma.done.wait [#allocation4], 256  }
 0x52f   :  { %1248 = vsyncadd [#allocation4], 4294967040 }
 0x530   :  { %675 = vsyncpa [#allocation3], 1 }
 0x531   :  { %676 = vsyncpa [#allocation6], 1 }
 0x532   :  { %677 = vsyncpa [#allocation9], 1 }
 0x533   :  { %678 = vsyncpa [#allocation4], 1 }

</bundles_post_ra>
